<compile_context>
chip_gen: v6e
topology: v6e:2x2x1
jax: 0.10.0
libtpu: 0.0.40
codegen_flags: <defaults>
</compile_context>

<pallas_src>
import jax
import jax.numpy as jnp
from jax.experimental import pallas as pl
from jax.experimental.pallas import tpu as pltpu


# Conservative VMEM sizing: keep live blocks under ~40 MiB so the kernel fits
# v7x's 64 MiB VMEM with headroom (v5e/v6e have 128 MiB); raise the scoped
# limit above the 16/32 MiB defaults so the big tiles are accepted.
_VMEM_BUDGET_BYTES = 40 * 1024 * 1024
_VMEM_LIMIT_BYTES = 48 * 1024 * 1024


def _round_up(x, m):
    return ((x + m - 1) // m) * m


def _round_down(x, m):
    return (x // m) * m


def _agwrp_kernel(x_ref, w_ref, o_ref):
    """Weighted reduce over the (pre-sorted) spatial axis.

    x_ref: (n_tile, C, l_tile) block, rows sorted ascending along the last axis.
    w_ref: (C, l_tile) normalized per-channel weights in matching order
           (block index constant across the row axis -> stays VMEM resident).
    o_ref: (n_tile, C) float32 output block; doubles as the accumulator across
           the (optional) L reduction axis of the grid.
    """
    @pl.when(pl.program_id(1) == 0)
    def _():
        o_ref[...] = jnp.zeros_like(o_ref)

    x = x_ref[...].astype(jnp.float32)
    w = w_ref[...].astype(jnp.float32)
    # VPU multiply + XLU lane-reduce; deliberately NOT routed to the MXU.
    o_ref[...] += jnp.sum(x * w[None, :, :], axis=2)


def _sigmoid_rank_weights(dc_logit, num_channels, length):
    """weights[c, j] = sigmoid(theta_c ** j), j = 0..L-1 (descending-rank order).

    theta_c is the module's raw parameter log(dc_c / (1 - dc_c)); the integer
    power is computed sign-correctly for theta < 0 (matching torch's `t ** j`).
    """
    theta = jnp.asarray(dc_logit, dtype=jnp.float32).reshape(-1)
    if theta.shape[0] == 1:
        theta = jnp.broadcast_to(theta, (num_channels,))
    j = jnp.arange(length)
    jf = j.astype(jnp.float32)
    abs_pow = jnp.exp(jf[None, :] * jnp.log(jnp.abs(theta))[:, None])
    neg_odd = (theta[:, None] < 0.0) & ((j[None, :] % 2) == 1)
    theta_pow = jnp.where(j[None, :] == 0, 1.0,
                          jnp.where(neg_odd, -abs_pow, abs_pow))
    return jax.nn.sigmoid(theta_pow)  # (C, L)


def _choose_tiles(n, c, length, x_itemsize):
    """Pick (n_tile, l_tile): blocks as big as possible (HBM bandwidth) yet in VMEM."""
    # Target ~1024 (n, c) rows per block; >=512-row tiles reach ~85% of HBM
    # roofline on v6e while tiny blocks are dominated by per-step overhead.
    n_tile = max(8, _round_down(max(1, 1024 // c), 8))
    n_tile = min(n_tile, _round_up(n, 8))
    l_tile = length

    def fits(nt, lt):
        x_bytes = 2 * nt * c * lt * x_itemsize   # double-buffered input blocks
        w_bytes = 2 * c * lt * 4                 # weight blocks (f32)
        o_bytes = 2 * nt * c * 4                 # output block
        return x_bytes + w_bytes + o_bytes <= _VMEM_BUDGET_BYTES

    while not fits(n_tile, l_tile) and n_tile > 8:
        n_tile = max(8, _round_down(n_tile // 2, 8))
    while not fits(n_tile, l_tile) and l_tile > 128:
        l_tile = max(128, _round_up(l_tile // 2, 128))
    return n_tile, l_tile


def adaptive_global_weighted_rank_pooling_2d(x, dc_logit):
    """Pallas forward of AdaptiveGlobalWeightedRankPooling2d.

    x:        (N, C, H, W) array.
    dc_logit: shape (1,) or (C,) — the module parameter log(dc / (1 - dc)).
    Returns:  (N, C) float32.
    """
    n, c, h, w_dim = x.shape
    length = h * w_dim
    xr = x.reshape(n, c, length)

    # TODO(synk): torch.sort has no Mosaic/Pallas lowering (lax.sort is
    # unsupported inside the kernel), so the sort stays in XLA. We sort
    # ASCENDING and fold the descending-rank order into the weight table,
    # which removes the previous jnp.flip (a full extra HBM pass).
    xs = jnp.sort(xr, axis=2)

    weights = _sigmoid_rank_weights(dc_logit, c, length)          # (C, L) rank-desc
    weights = weights / jnp.sum(weights, axis=1, keepdims=True)   # fold normalization
    weights = weights[:, ::-1]                                    # match ascending sort

    n_tile, l_tile = _choose_tiles(n, c, length, jnp.dtype(x.dtype).itemsize)
    n_pad = _round_up(n, n_tile)
    k_steps = pl.cdiv(length, l_tile)
    l_pad = k_steps * l_tile

    if n_pad != n or l_pad != length:
        # Exact: padded spatial positions get zero weight, padded batch rows
        # are sliced off below.
        xs = jnp.pad(xs, ((0, n_pad - n), (0, 0), (0, l_pad - length)))
    if l_pad != length:
        weights = jnp.pad(weights, ((0, 0), (0, l_pad - length)))

    out = pl.pallas_call(
        _agwrp_kernel,
        out_shape=jax.ShapeDtypeStruct((n_pad, c), jnp.float32),
        grid_spec=pltpu.PrefetchScalarGridSpec(
            num_scalar_prefetch=0,
            grid=(n_pad // n_tile, k_steps),
            in_specs=[
                pl.BlockSpec((n_tile, c, l_tile), lambda i, k: (i, 0, k)),
                pl.BlockSpec((c, l_tile), lambda i, k: (0, k)),
            ],
            out_specs=pl.BlockSpec((n_tile, c), lambda i, k: (i, 0)),
        ),
        compiler_params=pltpu.CompilerParams(
            dimension_semantics=("parallel", "arbitrary"),
            vmem_limit_bytes=_VMEM_LIMIT_BYTES),
    )(xs, weights)

    return out[:n]


def _reference(x, dc_logit):
    """Pure-JAX mirror of the PyTorch forward (descending sort, unnormalized w / sum)."""
    n, c, h, w_dim = x.shape
    length = h * w_dim
    xs = -jnp.sort(-x.reshape(n, c, length), axis=2)      # descending sort
    w = _sigmoid_rank_weights(dc_logit, c, length)        # (C, L)
    return jnp.sum(xs * w[None, :, :], axis=2) / jnp.sum(w, axis=1)[None, :]


if __name__ == "__main__":
    N, C, H, W = 2, 4, 16, 16
    key = jax.random.PRNGKey(0)
    x = jax.random.normal(key, (N, C, H, W), dtype=jnp.float32)

    # Per-channel dc (the "adaptive" case); covers theta > 1, 0 < theta < 1,
    # theta < 0 and theta >> 1 regimes of sigmoid(theta ** j).
    dc_per_channel = jnp.asarray([0.9, 0.6, 0.3, 0.999], dtype=jnp.float32)
    dc_logit = jnp.log(dc_per_channel / (1.0 - dc_per_channel))  # module parameter

    y = jax.block_until_ready(adaptive_global_weighted_rank_pooling_2d(x, dc_logit))
    y_ref = jax.block_until_ready(_reference(x, dc_logit))
    assert y.shape == (N, C)
    assert jnp.allclose(y, y_ref, rtol=1e-4, atol=1e-4), (y, y_ref)

    # Shared dc (default_config: single value broadcast over all channels).
    dc_shared = jnp.asarray([0.9], dtype=jnp.float32)
    dc_logit_shared = jnp.log(dc_shared / (1.0 - dc_shared))
    y2 = jax.block_until_ready(
        adaptive_global_weighted_rank_pooling_2d(x, dc_logit_shared))
    y2_ref = jax.block_until_ready(_reference(x, dc_logit_shared))
    assert jnp.allclose(y2, y2_ref, rtol=1e-4, atol=1e-4), (y2, y2_ref)

    print("KERNEL_OK")
</pallas_src>

<mosaic_0001>
module attributes {stable_mosaic.version = 11 : i64} {
  func.func @_agwrp_kernel(%arg0: i32, %arg1: i32, %arg2: memref<8x4x256xf32, #tpu.memory_space<vmem>>, %arg3: memref<4x256xf32, #tpu.memory_space<vmem>>, %arg4: memref<8x4xf32, #tpu.memory_space<vmem>>) attributes {dimension_semantics = [#tpu.dimension_semantics<parallel>, #tpu.dimension_semantics<arbitrary>], iteration_bounds = array<i64: 1, 1>, scalar_prefetch = 0 : i64, scratch_operands = 0 : i64, tpu.core_type = #tpu.core_type<tc>, window_params = [{transform_indices = @transform_0, window_bounds = array<i64: 8, 4, 256>}, {transform_indices = @transform_1, window_bounds = array<i64: 4, 256>}, {transform_indices = @transform_2, window_bounds = array<i64: 8, 4>}]} {
    %c0_i32 = arith.constant 0 : i32
    %0 = arith.cmpi eq, %arg1, %c0_i32 : i32
    %1 = arith.extui %0 : i1 to i32
    %c0_i32_0 = arith.constant 0 : i32
    %2 = arith.cmpi ne, %1, %c0_i32_0 : i32
    scf.if %2 {
      %cst_9 = arith.constant 0.000000e+00 : f32
      %12 = vector.broadcast %cst_9 : f32 to vector<8x4xf32>
      %c0_10 = arith.constant 0 : index
      %c0_11 = arith.constant 0 : index
      %13 = vector.load %arg4[%c0_10, %c0_11] : memref<8x4xf32, #tpu.memory_space<vmem>>, vector<8x4xf32>
      tpu.vector_store %arg4[%c0_10, %c0_11], %12 {strides = array<i32>} : memref<8x4xf32, #tpu.memory_space<vmem>>, vector<8x4xf32>,
    } else {
    }
    %c0 = arith.constant 0 : index
    %c0_1 = arith.constant 0 : index
    %c0_2 = arith.constant 0 : index
    %3 = vector.load %arg2[%c0, %c0_1, %c0_2] : memref<8x4x256xf32, #tpu.memory_space<vmem>>, vector<8x4x256xf32>
    %c0_3 = arith.constant 0 : index
    %c0_4 = arith.constant 0 : index
    %4 = vector.load %arg3[%c0_3, %c0_4] : memref<4x256xf32, #tpu.memory_space<vmem>>, vector<4x256xf32>
    %c0_5 = arith.constant 0 : index
    %c0_6 = arith.constant 0 : index
    %5 = vector.load %arg4[%c0_5, %c0_6] : memref<8x4xf32, #tpu.memory_space<vmem>>, vector<8x4xf32>
    %6 = vector.shape_cast %4 : vector<4x256xf32> to vector<1x4x256xf32>
    %7 = vector.broadcast %6 : vector<1x4x256xf32> to vector<8x4x256xf32>
    %8 = arith.mulf %3, %7 : vector<8x4x256xf32>
    %cst = arith.constant dense<0.000000e+00> : vector<8x4xf32>
    %9 = vector.multi_reduction <add>, %8, %cst [2] : vector<8x4x256xf32> to vector<8x4xf32>
    %10 = arith.addf %5, %9 : vector<8x4xf32>
    %c0_7 = arith.constant 0 : index
    %c0_8 = arith.constant 0 : index
    %11 = vector.load %arg4[%c0_7, %c0_8] : memref<8x4xf32, #tpu.memory_space<vmem>>, vector<8x4xf32>
    tpu.vector_store %arg4[%c0_7, %c0_8], %10 {strides = array<i32>} : memref<8x4xf32, #tpu.memory_space<vmem>>, vector<8x4xf32>,
    return
  }
  func.func @transform_0(%arg0: i32, %arg1: i32) -> (i32, i32, i32) {
    %c0_i32 = arith.constant 0 : i32
    %c0_i32_0 = arith.constant 0 : i32
    return %arg0, %c0_i32, %arg1 : i32, i32, i32
  }
  func.func @transform_1(%arg0: i32, %arg1: i32) -> (i32, i32) {
    %c0_i32 = arith.constant 0 : i32
    %c0_i32_0 = arith.constant 0 : i32
    return %c0_i32, %arg1 : i32, i32
  }
  func.func @transform_2(%arg0: i32, %arg1: i32) -> (i32, i32) {
    %c0_i32 = arith.constant 0 : i32
    %c0_i32_0 = arith.constant 0 : i32
    return %arg0, %c0_i32 : i32, i32
  }
}

</mosaic_0001>

<bundles_post_ra>
// kernel: tpu_custom_call.1
= control target key start
LH: loop header
LB: loop body
LE: loop exit
PB: predicated region body
PF: predicated region fallthrough
CT: control target
= control target key end

     0   :  { %7 = vsyncpa [#allocation3], 0  ;;  %s294_s0 = inlined_call_operand.hbm [shape: f32[8,4,256], index: 0, kind: input, shape index: {}]   ;;  %s295_s1 = inlined_call_operand.hbm [shape: f32[4,256], index: 1, kind: input, shape index: {}]   ;;  %s296_s2 = inlined_call_operand.vmem [shape: f32[8,4], index: 2, kind: output, shape index: {}]  }
   0x1   :  { %8 = vsyncpa [#allocation5], 0  ;;  %s241_s9 = smov [#allocation2]  }
   0x2   :  { %s14_s10 = sshll.u32 %s241_s9, 4  ;;  %s15_s10 = int_to_ptr.vmem [resolvable:$true] %s14_s10 }
   0x3   :  { %s205_s11 = scalar_lea.vmem %s15_s10, 1024  ;;  %p210_p1 = scmp.lt.s32.totalorder %s15_s10, %s15_s10 }
   0x4   :  { %p206_p0 = scmp.ne.s32.totalorder %s15_s10, %s205_s11  ;;  %p211_p2 = scmp.lt.s32.totalorder %s205_s11, %s205_s11 }
   0x6   :  { %p212_p3 = por %p211_p2, %p210_p1 }
   0x8   :  { %p213_p4 = pnand %p212_p3, %p206_p0 }
   0xa   :  { %216 = shalt.err (!%p213_p4)
}
   0xb   :  { %s242_s12 = smov 128   ;;  %s243_s13 = smov 8  }
   0xc   :  { %20 = dma.hbm_to_vmem [thread:$0]  %s294_s0, 1024, %s15_s10, [#allocation3], %s242_s12, %s242_s12, %s243_s13  }
   0xd   :  { %s244_s16 = smov [#allocation4]  }
   0xe   :  { %s27_s17 = sshll.u32 %s244_s16, 4  ;;  %s28_s17 = int_to_ptr.vmem [resolvable:$true] %s27_s17 }
   0xf   :  { %s225_s18 = scalar_lea.vmem %s28_s17, 128  ;;  %p230_p6 = scmp.lt.s32.totalorder %s28_s17, %s28_s17 }
  0x10   :  { %p226_p5 = scmp.ne.s32.totalorder %s28_s17, %s225_s18  ;;  %p231_p7 = scmp.lt.s32.totalorder %s225_s18, %s225_s18 }
  0x12   :  { %p232_p8 = por %p231_p7, %p230_p6 }
  0x14   :  { %p233_p9 = pnand %p232_p8, %p226_p5 }
  0x16   :  { %236 = shalt.err (!%p233_p9)
}
  0x17   :  { %30 = dma.hbm_to_vmem [thread:$0]  %s295_s1, 128, %s28_s17, [#allocation5]  }
  0x18   :  { %237 = dma.done.wait [#allocation3], 1024  }
  0x19   :  { %238 = vsyncadd [#allocation3], 4294966272 }
  0x1a   :  { %239 = dma.done.wait [#allocation5], 128  }
  0x1b   :  { %240 = vsyncadd [#allocation5], 4294967168  ;;  %v43_v0 = vld [vmem:[#allocation2] sm:$0xff]  ;;  %vm85_vm0 = vcmask 1043456   ;;  %v45_v2 = vld [vmem:[#allocation2 + $0x10] sm:$0xff]  ;;  %vm41_vm1 = vcmask 31744   ;;  %v134_v50 = vlaneseq }
  0x1c   :  { %v51_v1 = vld [vmem:[#allocation4] sm:$0xff]  ;;  %v44_v5 = vld [vmem:[#allocation2 + $0x8] sm:$0xff]  ;;  %v46_v6 = vld [vmem:[#allocation2 + $0x18] sm:$0xff]  ;;  %v245_v49 = vmov 0.0   ;;  %vm168_vm2 = vcmask 1041409   ;;  %vm170_vm3 = vcmask 1042434  }
  0x1d   :  { %v53_v3 = vmul.f32 %v51_v1, %v43_v0  ;;  %v55_v4 = vmul.f32 %v51_v1, %v45_v2  ;;  %v47_v7 = vld [vmem:[#allocation2 + $0x20] sm:$0xff]  ;;  %v54_v8 = vmul.f32 %v51_v1, %v44_v5  ;;  %v56_v9 = vmul.f32 %v51_v1, %v46_v6  ;;  %v48_v18 = vld [vmem:[#allocation2 + $0x28] sm:$0xff]  ;;  %v49_v23 = vld [vmem:[#allocation2 + $0x30] sm:$0xff]  ;;  %42 = vst.msk [vmem:[%s296_s2] sm:$0xff] %vm41_vm1, %v245_v49 }
  0x1e   :  { %v57_v10 = vmul.f32 %v51_v1, %v47_v7  ;;  %v50_v24 = vld [vmem:[#allocation2 + $0x38] sm:$0xff]  ;;  %v58_v30 = vmul.f32 %v51_v1, %v48_v18  ;;  %v59_v32 = vmul.f32 %v51_v1, %v49_v23  ;;  %v135_v51 = vand.u32 127, %v134_v50 }
  0x1f   :  { %v69_v11 = vcombine.high %v53_v3, %v53_v3  ;;  %v86_v12 = vsel %vm85_vm0, %v53_v3, 0.0  ;;  %v71_v13 = vcombine.high %v55_v4, %v55_v4  ;;  %v96_v14 = vsel %vm85_vm0, %v55_v4, 0.0 }
  0x20   :  { %v70_v15 = vcombine.high %v54_v8, %v54_v8  ;;  %v91_v16 = vsel %vm85_vm0, %v54_v8, 0.0  ;;  %v72_v17 = vcombine.high %v56_v9, %v56_v9  ;;  %v101_v21 = vsel %vm85_vm0, %v56_v9, 0.0 }
  0x21   :  { %v87_v19 = vsel %vm85_vm0, %v69_v11, 0.0  ;;  %v97_v20 = vsel %vm85_vm0, %v71_v13, 0.0  ;;  %v73_v22 = vcombine.high %v57_v10, %v57_v10  ;;  %v60_v33 = vmul.f32 %v51_v1, %v50_v24 }
  0x22   :  { %v88_v25 = vadd.f32 %v87_v19, %v86_v12  ;;  %v98_v26 = vadd.f32 %v97_v20, %v96_v14  ;;  %v92_v27 = vsel %vm85_vm0, %v70_v15, 0.0  ;;  %v102_v28 = vsel %vm85_vm0, %v72_v17, 0.0 }
  0x23   :  { %v93_v29 = vadd.f32 %v92_v27, %v91_v16  ;;  %v103_v31 = vadd.f32 %v102_v28, %v101_v21  ;;  %v106_v34 = vsel %vm85_vm0, %v57_v10, 0.0  ;;  %v107_v35 = vsel %vm85_vm0, %v73_v22, 0.0 }
  0x24   :  { %89 = vadd.xlane.f32.xlu0 %v88_v25  ;;  %99 = vadd.xlane.f32.xlu1 %v98_v26  ;;  %v74_v36 = vcombine.high %v58_v30, %v58_v30  ;;  %v111_v37 = vsel %vm85_vm0, %v58_v30, 0.0  ;;  %v75_v38 = vcombine.high %v59_v32, %v59_v32  ;;  %v76_v39 = vcombine.high %v60_v33, %v60_v33  ;;  %v52_v11 = vld [vmem:[%s296_s2] sm:$0xff] }
  0x25   :  { %v108_v41 = vadd.f32 %v107_v35, %v106_v34  ;;  %v116_v43 = vsel %vm85_vm0, %v59_v32, 0.0  ;;  %v121_v45 = vsel %vm85_vm0, %v60_v33, 0.0  ;;  %v137_v52 = vshrl.u32 %v134_v50, 7 }
  0x26   :  { %v112_v40 = vsel %vm85_vm0, %v74_v36, 0.0  ;;  %v117_v44 = vsel %vm85_vm0, %v75_v38, 0.0  ;;  %v122_v46 = vsel %vm85_vm0, %v76_v39, 0.0  ;;  %vm172_vm4 = vcmask 1043459  }
  0x27   :  { %v113_v42 = vadd.f32 %v112_v40, %v111_v37  ;;  %v118_v47 = vadd.f32 %v117_v44, %v116_v43  ;;  %v123_v48 = vadd.f32 %v122_v46, %v121_v45  ;;  %v138_v55 = vsub.s32 %v135_v51, %v137_v52 }
  0x28   :  { %94 = vadd.xlane.f32.xlu0 %v93_v29  ;;  %104 = vadd.xlane.f32.xlu1 %v103_v31  ;;  %vm174_vm5 = vcmask 1044484   ;;  %vm176_vm6 = vcmask 1045509   ;;  %vm178_vm7 = vcmask 1046534   ;;  %vm180_vm8 = vcmask 1047559  }
  0x2c   :  { %109 = vadd.xlane.f32.xlu0 %v108_v41  ;;  %114 = vadd.xlane.f32.xlu1 %v113_v42 }
  0x30   :  { %119 = vadd.xlane.f32.xlu0 %v118_v47  ;;  %124 = vadd.xlane.f32.xlu1 %v123_v48 }
  0xad   :  { %v90_v53 = vpop.xlane.xlu0 %89  ;;  %v100_v54 = vpop.xlane.xlu1 %99 }
  0xae   :  { %v139_v58 = vrot.slane %v90_v53, %v138_v55  ;;  %v147_v61 = vrot.slane %v100_v54, %v138_v55 }
  0xb1   :  { %v95_v56 = vpop.xlane.xlu0 %94  ;;  %v105_v57 = vpop.xlane.xlu1 %104 }
  0xb2   :  { %v143_v59 = vrot.slane %v95_v56, %v138_v55  ;;  %v151_v60 = vrot.slane %v105_v57, %v138_v55 }
  0xb4   :  { %v169_v62 = vsel %vm168_vm2, %v143_v59, %v139_v58 }
  0xb5   :  { %v171_v63 = vsel %vm170_vm3, %v147_v61, %v169_v62  ;;  %v110_v0 = vpop.xlane.xlu0 %109  ;;  %v115_v1 = vpop.xlane.xlu1 %114 }
  0xb6   :  { %v173_v2 = vsel %vm172_vm4, %v151_v60, %v171_v63  ;;  %v155_v3 = vrot.slane %v110_v0, %v138_v55  ;;  %v159_v4 = vrot.slane %v115_v1, %v138_v55 }
  0xb8   :  { %v175_v5 = vsel %vm174_vm5, %v155_v3, %v173_v2 }
  0xb9   :  { %v120_v6 = vpop.xlane.xlu0 %119  ;;  %v125_v7 = vpop.xlane.xlu1 %124  ;;  %v177_v10 = vsel %vm176_vm6, %v159_v4, %v175_v5 }
  0xba   :  { %v163_v8 = vrot.slane %v120_v6, %v138_v55  ;;  %v167_v9 = vrot.slane %v125_v7, %v138_v55 }
  0xbc   :  { %v179_v12 = vsel %vm178_vm7, %v163_v8, %v177_v10 }
  0xbd   :  { %v181_v13 = vsel %vm180_vm8, %v167_v9, %v179_v12 }
  0xbe   :  { %v183_v14 = vadd.f32 %v181_v13, %v52_v11 }
  0xc0   :  { %185 = vst.msk [vmem:[%s296_s2] sm:$0xff] %vm41_vm1, %v183_v14 }
  0xc1   :  { %190 = vsyncpa [#allocation3], 1 }
  0xc2   :  { %191 = vsyncpa [#allocation5], 1 }

</bundles_post_ra>
